<compile_context>
chip_gen: v6e
topology: v6e:2x2x1
jax: 0.10.0
libtpu: 0.0.40
codegen_flags: <defaults>
</compile_context>

<pallas_src>
import math

import numpy as np
import jax
import jax.numpy as jnp
from jax.experimental import pallas as pl
from jax.experimental.pallas import tpu as pltpu


def _round_up(n, m):
    return ((n + m - 1) // m) * m


def box_kernel(flag_ref, x_ref, p_ref, o_ref):
    """One (TB, TD) tile of the Box transform.

    flag_ref (SMEM, scalar-prefetched): flag_ref[j] != 0 iff lane-tile j
    contains at least one constrained column; tiles without any are a pure
    copy (no transcendentals at all).
    p_ref: (4, TD) f32 rows = [lo, hi, exp(hi-lo), mask] per column.
    """
    j = pl.program_id(0)  # lane-tile index (outer grid axis)

    @pl.when(flag_ref[j] == 0)
    def _copy():
        o_ref[...] = x_ref[...]

    @pl.when(flag_ref[j] != 0)
    def _transform():
        x = x_ref[...].astype(jnp.float32)
        p = p_ref[...]                                   # (4, TD) f32
        lo, hi, ehl, m = p[0:1, :], p[1:2, :], p[2:3, :], p[3:4, :]
        # y = lo + softplus(x-lo) - softplus(x-hi)
        #   = hi - log((e^a + e^b)/(1 + e^a)),  a = x-lo, b = hi-lo > 0.
        # Stable single-exp / single-log form (rewrite ratio with s = e^-|a|):
        a = x - lo
        s = jnp.exp(-jnp.abs(a))                         # in (0, 1]
        num = jnp.where(a >= 0.0, 1.0 + ehl * s, s + ehl)
        y = hi - jnp.log(num / (1.0 + s))
        # Blend (no compare): unconstrained columns (m == 0) pass x exactly.
        o_ref[...] = (x + m * (y - x)).astype(o_ref.dtype)


def _make_params(constrained_ixs, lims, d):
    lo = np.zeros((d,), np.float32)
    hi = np.zeros((d,), np.float32)
    msk = np.zeros((d,), np.float32)
    for k, j in enumerate(constrained_ixs):
        lo[j] = float(lims[k][0])
        hi[j] = float(lims[k][1])
        msk[j] = 1.0
    return lo, hi, msk


def box_forward(x, constrained_ixs, lims, *, tile_b=1024, tile_d=512,
                max_block_bytes=4 << 20):
    """Box.forward: constrained columns squashed into (lo, hi), rest identity.

    NOTE: exact rewrite of the PyTorch formula for hi > lo; for degenerate
    limits (hi <= lo) PyTorch produces NaN while this stays finite.
    Output dtype == input dtype; math done in f32 in-register.
    """
    assert x.ndim == 2
    orig_b, orig_d = x.shape
    dtype = x.dtype
    itemsize = jnp.dtype(dtype).itemsize
    sub = 8 * max(1, 4 // itemsize)          # sublane multiple: f32 8, bf16 16

    lo, hi, msk = _make_params(constrained_ixs, lims, orig_d)

    # ---- narrow-feature fold: (b, d) -> (b/k, k*d), a free row-major view ---
    # Keeps HBM traffic exact and lanes dense instead of padding d up to 128.
    b, d = orig_b, orig_d
    k = 1
    if d % 128 != 0:
        k0 = 128 // math.gcd(d, 128)         # minimal k with (k*d) % 128 == 0
        if k0 * d <= max(tile_d, 128) and b % k0 == 0:
            k = k0
            while 2 * k * d <= tile_d and b % (2 * k) == 0:
                k *= 2
    if k > 1:
        x = x.reshape(b // k, k * d)
        b, d = x.shape
        lo, hi, msk = np.tile(lo, k), np.tile(hi, k), np.tile(msk, k)

    # ---- lane (feature) tiling ----------------------------------------------
    if d % 128 == 0:
        td = max(128, (min(tile_d, d) // 128) * 128)
        while d % td:
            td -= 128
        nd = d // td
    else:
        # full-width block (== full array dim): exact HBM bytes, only the
        # in-VMEM lane padding is masked.
        td, nd = d, 1

    # ---- batch tiling: no padding, ragged last tile handled by Pallas -------
    if b <= sub:
        tb = b
    else:
        tb_cap = max(sub, (max_block_bytes // max(td * itemsize, 1)) // sub * sub)
        # keep >= 2 batch tiles so both v7x TensorCores get work
        tb = min(tile_b, tb_cap, _round_up(pl.cdiv(b, 2), sub))
        tb = max(sub, (tb // sub) * sub)
    nb = pl.cdiv(b, tb)

    # ---- per-lane-tile "has constrained columns" flag (scalar prefetch) -----
    if nd > 1:
        flag = (msk.reshape(nd, td).sum(axis=1) > 0).astype(np.int32)
    else:
        flag = np.array([1 if msk.any() else 0], np.int32)
    flag = jnp.asarray(flag)

    # merged per-column constants: [lo, hi, exp(hi-lo), mask]  -> one small DMA
    params = jnp.asarray(np.stack([lo, hi, np.exp(hi - lo), msk], axis=0))

    # ---- VMEM budget: double-buffered x/out blocks + param block + slack ----
    blk = tb * td * itemsize
    pblk = 8 * _round_up(td, 128) * 4
    vmem_bytes = int(min(max(4 * blk + 2 * pblk + (2 << 20), 8 << 20), 48 << 20))

    out = pl.pallas_call(
        box_kernel,
        out_shape=jax.ShapeDtypeStruct((b, d), dtype),
        grid_spec=pltpu.PrefetchScalarGridSpec(
            num_scalar_prefetch=1,
            # lane-tile axis outermost: the tiny (4, td) param block keeps the
            # same block index across the whole inner batch loop (stays resident).
            grid=(nd, nb),
            in_specs=[
                pl.BlockSpec((tb, td), lambda j, i, f: (i, j)),   # x
                pl.BlockSpec((4, td), lambda j, i, f: (0, j)),    # [lo,hi,e,mask]
            ],
            out_specs=pl.BlockSpec((tb, td), lambda j, i, f: (i, j)),
        ),
        compiler_params=pltpu.CompilerParams(
            dimension_semantics=("parallel", "parallel"),
            vmem_limit_bytes=vmem_bytes,
        ),
    )(flag, x, params)

    if k > 1:
        out = out.reshape(orig_b, orig_d)
    return out


def box_forward_ref(x, constrained_ixs, not_constrained_ixs, lims):
    """Pure-JAX transliteration of the PyTorch forward (for verification)."""
    lims_a = jnp.asarray(lims, jnp.float32)
    xf = x.astype(jnp.float32)
    split1 = xf[:, jnp.asarray(constrained_ixs)]
    split2 = xf[:, jnp.asarray(not_constrained_ixs)]
    greater_than = jax.nn.softplus(split1 - lims_a[:, 0][None, :])
    offset = jnp.log(jnp.exp(lims_a[:, 1] - lims_a[:, 0]) - 1.0)[None, :]
    less_than = -jax.nn.softplus(-greater_than + offset) + lims_a[:, 1][None, :]
    cat = jnp.concatenate([less_than, split2], axis=1)
    reverse = np.argsort(list(constrained_ixs) + list(not_constrained_ixs))
    return cat[:, jnp.asarray(reverse)]


if __name__ == "__main__":
    # --- test 1: module-like shape (batch=16, features=8); narrow-d fold -----
    B, D = 16, 8
    cix = [1, 3]
    ncix = [j for j in range(D) if j not in cix]
    # NOTE: lims chosen with hi > lo; the module's default ((0.25,-0.25),...)
    # makes the PyTorch formula NaN (log of a negative number).
    lims = ((-1.0, 1.0), (0.5, 5.5))
    x = jax.random.normal(jax.random.PRNGKey(0), (B, D), dtype=jnp.float32)
    out = jax.block_until_ready(box_forward(x, cix, lims))
    ref = box_forward_ref(x, cix, ncix, lims)
    np.testing.assert_allclose(np.asarray(out), np.asarray(ref), atol=3e-5, rtol=1e-5)

    # --- test 2: non-multiple-of-128 feature width, several batch tiles ------
    B2, D2 = 48, 272
    cix2 = [1, 130]
    ncix2 = [j for j in range(D2) if j not in cix2]
    lims2 = ((-2.0, 2.0), (0.0, 4.0))
    x2 = jax.random.normal(jax.random.PRNGKey(1), (B2, D2), dtype=jnp.float32)
    out2 = jax.block_until_ready(box_forward(x2, cix2, lims2, tile_b=16))
    ref2 = box_forward_ref(x2, cix2, ncix2, lims2)
    np.testing.assert_allclose(np.asarray(out2), np.asarray(ref2), atol=3e-5, rtol=1e-5)

    # --- test 3: lane-tiled path (skip-copy lane tile) + ragged batch edge ---
    B3, D3 = 50, 256
    cix3 = [3, 40]
    ncix3 = [j for j in range(D3) if j not in cix3]
    lims3 = ((-1.5, 1.5), (0.25, 3.25))
    x3 = jax.random.normal(jax.random.PRNGKey(2), (B3, D3), dtype=jnp.float32)
    out3 = jax.block_until_ready(box_forward(x3, cix3, lims3, tile_b=16, tile_d=128))
    ref3 = box_forward_ref(x3, cix3, ncix3, lims3)
    np.testing.assert_allclose(np.asarray(out3), np.asarray(ref3), atol=3e-5, rtol=1e-5)

    # --- test 4: bf16 in -> bf16 out (f32 math in-register) ------------------
    x4 = jax.random.normal(jax.random.PRNGKey(3), (32, D), dtype=jnp.float32)
    x4 = x4.astype(jnp.bfloat16)
    out4 = jax.block_until_ready(box_forward(x4, cix, lims))
    assert out4.dtype == jnp.bfloat16
    ref4 = box_forward_ref(x4.astype(jnp.float32), cix, ncix, lims)
    np.testing.assert_allclose(np.asarray(out4.astype(jnp.float32)), np.asarray(ref4),
                               atol=5e-2, rtol=5e-2)

    print("KERNEL_OK")
</pallas_src>

<mosaic_0001>
module attributes {stable_mosaic.version = 11 : i64} {
  func.func @box_kernel(%arg0: i32, %arg1: i32, %arg2: memref<1xi32, #tpu.memory_space<smem>>, %arg3: memref<1x128xf32, #tpu.memory_space<vmem>>, %arg4: memref<4x128xf32, #tpu.memory_space<vmem>>, %arg5: memref<1x128xf32, #tpu.memory_space<vmem>>) attributes {dimension_semantics = [#tpu.dimension_semantics<parallel>, #tpu.dimension_semantics<parallel>], iteration_bounds = array<i64: 1, 1>, scalar_prefetch = 1 : i64, scratch_operands = 0 : i64, tpu.core_type = #tpu.core_type<tc>, window_params = [{transform_indices = @transform_0, window_bounds = array<i64: 1, 128>}, {transform_indices = @transform_1, window_bounds = array<i64: 4, 128>}, {transform_indices = @transform_2, window_bounds = array<i64: 1, 128>}]} {
    %0 = arith.index_cast %arg0 : i32 to index
    %1 = memref.load %arg2[%0] : memref<1xi32, #tpu.memory_space<smem>>
    %c0_i32 = arith.constant 0 : i32
    %2 = arith.cmpi eq, %1, %c0_i32 : i32
    %3 = arith.extui %2 : i1 to i32
    %c0_i32_0 = arith.constant 0 : i32
    %4 = arith.cmpi ne, %3, %c0_i32_0 : i32
    scf.if %4 {
      %c0 = arith.constant 0 : index
      %c0_3 = arith.constant 0 : index
      %10 = vector.load %arg3[%c0, %c0_3] : memref<1x128xf32, #tpu.memory_space<vmem>>, vector<1x128xf32>
      %c0_4 = arith.constant 0 : index
      %c0_5 = arith.constant 0 : index
      %11 = vector.load %arg5[%c0_4, %c0_5] : memref<1x128xf32, #tpu.memory_space<vmem>>, vector<1x128xf32>
      tpu.vector_store %arg5[%c0_4, %c0_5], %10 {strides = array<i32>} : memref<1x128xf32, #tpu.memory_space<vmem>>, vector<1x128xf32>,
    } else {
    }
    %5 = arith.index_cast %arg0 : i32 to index
    %6 = memref.load %arg2[%5] : memref<1xi32, #tpu.memory_space<smem>>
    %c0_i32_1 = arith.constant 0 : i32
    %7 = arith.cmpi ne, %6, %c0_i32_1 : i32
    %8 = arith.extui %7 : i1 to i32
    %c0_i32_2 = arith.constant 0 : i32
    %9 = arith.cmpi ne, %8, %c0_i32_2 : i32
    scf.if %9 {
      %c0 = arith.constant 0 : index
      %c0_3 = arith.constant 0 : index
      %10 = vector.load %arg3[%c0, %c0_3] : memref<1x128xf32, #tpu.memory_space<vmem>>, vector<1x128xf32>
      %c0_4 = arith.constant 0 : index
      %c0_5 = arith.constant 0 : index
      %11 = vector.load %arg4[%c0_4, %c0_5] : memref<4x128xf32, #tpu.memory_space<vmem>>, vector<4x128xf32>
      %12 = vector.extract_strided_slice %11 {offsets = [0, 0], sizes = [1, 128], strides = [1, 1]} : vector<4x128xf32> to vector<1x128xf32>
      %13 = vector.extract_strided_slice %11 {offsets = [1, 0], sizes = [1, 128], strides = [1, 1]} : vector<4x128xf32> to vector<1x128xf32>
      %14 = vector.extract_strided_slice %11 {offsets = [2, 0], sizes = [1, 128], strides = [1, 1]} : vector<4x128xf32> to vector<1x128xf32>
      %15 = vector.extract_strided_slice %11 {offsets = [3, 0], sizes = [1, 128], strides = [1, 1]} : vector<4x128xf32> to vector<1x128xf32>
      %16 = arith.subf %10, %12 : vector<1x128xf32>
      %17 = math.absf %16 : vector<1x128xf32>
      %cst = arith.constant 0.000000e+00 : f32
      %18 = vector.broadcast %cst : f32 to vector<1x128xf32>
      %19 = arith.subf %18, %17 : vector<1x128xf32>
      %20 = math.exp %19 : vector<1x128xf32>
      %cst_6 = arith.constant 0.000000e+00 : f32
      %21 = vector.broadcast %cst_6 : f32 to vector<1x128xf32>
      %22 = arith.cmpf oge, %16, %21 : vector<1x128xf32>
      %23 = arith.mulf %14, %20 : vector<1x128xf32>
      %cst_7 = arith.constant 1.000000e+00 : f32
      %24 = vector.broadcast %cst_7 : f32 to vector<1x128xf32>
      %25 = arith.addf %24, %23 : vector<1x128xf32>
      %26 = arith.addf %20, %14 : vector<1x128xf32>
      %27 = arith.select %22, %25, %26 : vector<1x128xi1>, vector<1x128xf32>
      %cst_8 = arith.constant 1.000000e+00 : f32
      %28 = vector.broadcast %cst_8 : f32 to vector<1x128xf32>
      %29 = arith.addf %28, %20 : vector<1x128xf32>
      %30 = arith.divf %27, %29 : vector<1x128xf32>
      %31 = math.log %30 : vector<1x128xf32>
      %32 = arith.subf %13, %31 : vector<1x128xf32>
      %33 = arith.subf %32, %10 : vector<1x128xf32>
      %34 = arith.mulf %15, %33 : vector<1x128xf32>
      %35 = arith.addf %10, %34 : vector<1x128xf32>
      %c0_9 = arith.constant 0 : index
      %c0_10 = arith.constant 0 : index
      %36 = vector.load %arg5[%c0_9, %c0_10] : memref<1x128xf32, #tpu.memory_space<vmem>>, vector<1x128xf32>
      tpu.vector_store %arg5[%c0_9, %c0_10], %35 {strides = array<i32>} : memref<1x128xf32, #tpu.memory_space<vmem>>, vector<1x128xf32>,
    } else {
    }
    return
  }
  func.func @transform_0(%arg0: i32, %arg1: i32, %arg2: memref<1xi32, #tpu.memory_space<smem>>) -> (i32, i32) {
    %c0_i32 = arith.constant 0 : i32
    return %arg1, %arg0 : i32, i32
  }
  func.func @transform_1(%arg0: i32, %arg1: i32, %arg2: memref<1xi32, #tpu.memory_space<smem>>) -> (i32, i32) {
    %c0_i32 = arith.constant 0 : i32
    %c0_i32_0 = arith.constant 0 : i32
    return %c0_i32, %arg0 : i32, i32
  }
  func.func @transform_2(%arg0: i32, %arg1: i32, %arg2: memref<1xi32, #tpu.memory_space<smem>>) -> (i32, i32) {
    %c0_i32 = arith.constant 0 : i32
    return %arg1, %arg0 : i32, i32
  }
}

</mosaic_0001>

<bundles_post_ra>
// kernel: tpu_custom_call.1
= control target key start
LH: loop header
LB: loop body
LE: loop exit
PB: predicated region body
PF: predicated region fallthrough
CT: control target
= control target key end

     0   :  { %s241_s0 = inlined_call_operand.<no memory space> [shape: s32[1], index: 0, kind: input, shape index: {}]   ;;  %s242_s1 = inlined_call_operand.vmem [shape: f32[1,128], index: 1, kind: input, shape index: {}]   ;;  %s243_s2 = inlined_call_operand.hbm [shape: f32[4,128], index: 2, kind: input, shape index: {}]   ;;  %s244_s3 = inlined_call_operand.hbm [shape: f32[1,128], index: 3, kind: output, shape index: {}]  }
   0x1   :  { %8 = sst [smem:[#allocation3]] %s241_s0 }
   0x2   :  { %9 = vsyncpa [#allocation5], 0 }
   0x3   :  { %10 = vsyncpa [#allocation6], 0  ;;  %s203_s14 = smov [#allocation4]  }
   0x4   :  { %s19_s15 = sshll.u32 %s203_s14, 4  ;;  %s20_s15 = int_to_ptr.vmem [resolvable:$true] %s19_s15 }
   0x5   :  { %s167_s16 = scalar_lea.vmem %s20_s15, 64  ;;  %p172_p1 = scmp.lt.s32.totalorder %s20_s15, %s20_s15 }
   0x6   :  { %p168_p0 = scmp.ne.s32.totalorder %s20_s15, %s167_s16  ;;  %p173_p2 = scmp.lt.s32.totalorder %s167_s16, %s167_s16 }
   0x8   :  { %p174_p3 = por %p173_p2, %p172_p1 }
   0xa   :  { %p175_p4 = pnand %p174_p3, %p168_p0 }
   0xc   :  { %178 = shalt.err (!%p175_p4)
}
   0xd   :  { %22 = dma.hbm_to_vmem [thread:$0]  %s243_s2, 64, %s20_s15, [#allocation5]  }
   0xe   :  { %199 = dma.done.wait [#allocation5], 64  }
   0xf   :  { %200 = vsyncadd [#allocation5], 4294967232  ;;  %s26_s19 = sld [smem:[#allocation3]] }
  0x15   :  { %p148_p5 = scmp.ne.s32.totalorder %s26_s19, 0 }
  0x17   :  { %30 = sbr.rel (%p148_p5) target bundleno = 30 (0x1e), region = 17 }
  0x1c   :  { %v31_v0 = vld [vmem:[%s242_s1] sm:$0x1] }
  0x1d   :  { %32 = vst [vmem:[#allocation7] sm:$0x1] %v31_v0 }
  0x1e PF:  { %s33_s21 = sld [smem:[#allocation3]] }
  0x24   :  { %p149_p6 = scmp.eq.s32.totalorder %s33_s21, 0 }
  0x26   :  { %37 = sbr.rel (%p149_p6) target bundleno = 122 (0x7a), region = 21 }
  0x2b   :  { %v38_v1 = vld [vmem:[%s242_s1] sm:$0x1]  ;;  %v204_v7 = vmov 1966171168   ;;  %v47_v9 = vlaneseq }
  0x2c   :  { %v39_v2 = vld [vmem:[#allocation4] sm:$0xf]  ;;  %v56_v8 = vunpack.c.l.s4 %v204_v7 }
  0x2d   :  { %v40_v3 = vsub.f32 %v38_v1, %v39_v2  ;;  %v48_v11 = vshrl.u32 %v47_v9, 7 }
  0x2e   :  { %v57_v10 = vunpack.c.0.s8 %v56_v8 }
  0x2f   :  { %v41_v4 = vand.u32 2147483647, %v40_v3  ;;  %v49_v13 = vsub.s32 0, %v48_v11  ;;  %vm45_vm0 = vcmp.ge.f32.partialorder %v40_v3, 0.0 }
  0x30   :  { %v60_v12 = vsub.s32 %v57_v10, %v48_v11 }
  0x31   :  { %v42_v5 = vsub.f32 0.0, %v41_v4  ;;  %v106_v32 = vrot.slane %v38_v1, %v49_v13 }
  0x32   :  { %v61_v14 = vrot.slane %v39_v2, %v60_v12 }
  0x33   :  { %v43_v6 = vmul.f32 1.442695, %v42_v5 }
  0x34   :  { %v68_v18 = vrot.slane %v61_v14, %v60_v12 }
  0x35   :  { %153 = vpow2.f32 %v43_v6 }
  0x36   :  { %v69_v21 = vcombine.high %v68_v18, %v68_v18 }
  0x42   :  { %v154_v15 = vpop.eup %153 }
  0x43   :  { %v50_v16 = vrot.slane %v154_v15, %v49_v13  ;;  %v90_v17 = vadd.f32 1.0, %v154_v15  ;;  %v71_v24 = vadd.f32 %v154_v15, %v69_v21 }
  0x45   :  { %v52_v19 = vmul.f32 %v50_v16, %v39_v2  ;;  %155 = vrcp.f32 %v90_v17 }
  0x47   :  { %v53_v20 = vadd.f32 1.0, %v52_v19 }
  0x49   :  { %v79_v22 = vrot.slane %v53_v20, %v60_v12 }
  0x4b   :  { %v86_v23 = vrot.slane %v79_v22, %v60_v12 }
  0x4d   :  { %v87_v25 = vcombine.high %v86_v23, %v86_v23 }
  0x4f   :  { %v89_v26 = vsel %vm45_vm0, %v87_v25, %v71_v24 }
  0x52   :  { %v156_v27 = vpop.eup %155 }
  0x53   :  { %v92_v28 = vmul.f32 %v156_v27, %v89_v26 }
  0x55   :  { %157 = vlog2.f32 %v92_v28 }
  0x62   :  { %v158_v29 = vpop.eup %157 }
  0x63   :  { %v94_v30 = vmul.f32 0.6931472, %v158_v29 }
  0x65   :  { %v99_v31 = vrot.slane %v94_v30, %v49_v13 }
  0x67   :  { %v101_v33 = vsub.f32 %v39_v2, %v99_v31 }
  0x69   :  { %v108_v34 = vsub.f32 %v101_v33, %v106_v32 }
  0x6b   :  { %v110_v35 = vrot.slane %v108_v34, 6 }
  0x6d   :  { %v112_v36 = vmul.f32 %v110_v35, %v39_v2 }
  0x6f   :  { %v120_v37 = vrot.slane %v112_v36, %v60_v12 }
  0x71   :  { %v121_v38 = vcombine.high %v120_v37, %v120_v37 }
  0x73   :  { %v128_v39 = vrot.slane %v121_v38, %v60_v12 }
  0x75   :  { %v129_v40 = vcombine.high %v128_v39, %v128_v39 }
  0x77   :  { %v131_v41 = vadd.f32 %v129_v40, %v38_v1 }
  0x79   :  { %132 = vst [vmem:[#allocation7] sm:$0x1] %v131_v41 }
  0x7a PF:  { %s205_s1 = smov [#allocation7]  }
  0x7b   :  { %s139_s2 = sshll.u32 %s205_s1, 4  ;;  %s140_s2 = int_to_ptr.vmem [resolvable:$true] %s139_s2 }
  0x7c   :  { %s179_s24 = scalar_lea.vmem %s140_s2, 16  ;;  %s183_s25 = scalar_lea.vmem %s140_s2, 32 }
  0x7d   :  { %p180_p7 = scmp.ne.s32.totalorder %s140_s2, %s179_s24  ;;  %p184_p8 = scmp.lt.s32.totalorder %s140_s2, %s140_s2 }
  0x7e   :  { %p185_p9 = scmp.lt.s32.totalorder %s183_s25, %s179_s24 }
  0x80   :  { %p186_p10 = por %p185_p9, %p184_p8 }
  0x82   :  { %p187_p11 = pnand %p186_p10, %p180_p7 }
  0x84   :  { %190 = shalt.err (!%p187_p11)
}
  0x85   :  { %142 = dma.vmem_to_hbm [thread:$0]  %s140_s2, 16, %s244_s3, [#allocation6]  }
  0x86   :  { %201 = dma.done.wait [#allocation6], 16  }
  0x87   :  { %202 = vsyncadd [#allocation6], 4294967280 }
  0x88   :  { %146 = vsyncpa [#allocation5], 1 }
  0x89   :  { %147 = vsyncpa [#allocation6], 1 }

</bundles_post_ra>
